<compile_context>
chip_gen: v7x
topology: tpu7x:2x2x1
jax: 0.10.0
libtpu: 0.0.40
codegen_flags: <defaults>
</compile_context>

<pallas_src>
import jax
import jax.numpy as jnp
from jax.experimental import pallas as pl
from jax.experimental.pallas import tpu as pltpu


def mlp_kernel(x_ref, w1_ref, b1_ref, w2_ref, b2_ref, o_ref):
    x = x_ref[...]                       # (TB, input_dim)
    tb = x.shape[0]
    in_dim = x.shape[1]
    size = w1_ref.shape[1]               # hidden / output width

    # ---- Layer 1: Linear(input_dim -> size) + ReLU --------------------------
    if in_dim <= 8:
        # K is tiny: a static-unrolled VPU broadcast-multiply-add chain beats
        # driving the MXU with a K=3 contraction.
        h = jnp.broadcast_to(b1_ref[...], (tb, size))
        for k in range(in_dim):          # static unroll (in_dim is small)
            h = h + x[:, k:k + 1] * w1_ref[k:k + 1, :]
    else:
        h = jnp.dot(x, w1_ref[...], preferred_element_type=jnp.float32)
        h = h + b1_ref[...]
    h = jnp.maximum(h, 0.0)

    # ---- Layer 2: Linear(size -> size) + ReLU (MXU) --------------------------
    o = jnp.dot(h, w2_ref[...], preferred_element_type=jnp.float32)
    o = o + b2_ref[...]
    o_ref[...] = jnp.maximum(o, 0.0).astype(o_ref.dtype)


def _num_tensorcores():
    """Grid steps wanted per call: 1 on single-TC chips, num_cores on v7x."""
    try:
        return max(1, int(getattr(jax.devices()[0], "num_cores", 1)))
    except Exception:
        return 1


def mlp_forward(x, w1, b1, w2, b2, *, num_tiles=None):
    """Fused MLP forward. w*: (in, out) layout, b*: (1, out)."""
    batch, input_dim = x.shape
    size = w1.shape[1]

    # Tile the batch axis only as much as needed to keep every TensorCore
    # busy; extra grid steps are pure serial overhead on 1-TC chips.
    steps = num_tiles if num_tiles is not None else _num_tensorcores()
    steps = max(1, min(steps, batch))
    if steps == 1:
        tb = batch                                   # block == full dim: OK
    else:
        tb = pl.cdiv(batch, steps)
        tb = ((tb + 7) // 8) * 8                     # sublane-aligned tiles
    grid = (pl.cdiv(batch, tb),)

    return pl.pallas_call(
        mlp_kernel,
        out_shape=jax.ShapeDtypeStruct((batch, size), jnp.float32),
        grid=grid,
        in_specs=[
            pl.BlockSpec((tb, input_dim), lambda i: (i, 0)),     # streamed x
            pl.BlockSpec((input_dim, size), lambda i: (0, 0)),   # resident w1
            pl.BlockSpec((1, size), lambda i: (0, 0)),           # resident b1
            pl.BlockSpec((size, size), lambda i: (0, 0)),        # resident w2
            pl.BlockSpec((1, size), lambda i: (0, 0)),           # resident b2
        ],
        out_specs=pl.BlockSpec((tb, size), lambda i: (i, 0)),
        compiler_params=pltpu.CompilerParams(
            dimension_semantics=("parallel",),
        ),
    )(x, w1, b1, w2, b2)


def init_linear(key, fan_in, fan_out):
    # Deterministic init mimicking PyTorch nn.Linear: U(-1/sqrt(fan_in), ...)
    kw, kb = jax.random.split(key)
    bound = 1.0 / jnp.sqrt(fan_in)
    w = jax.random.uniform(kw, (fan_in, fan_out), jnp.float32, -bound, bound)
    b = jax.random.uniform(kb, (1, fan_out), jnp.float32, -bound, bound)
    return w, b


if __name__ == "__main__":
    key = jax.random.PRNGKey(0)
    k_x, k_l1, k_l2 = jax.random.split(key, 3)

    # Pendulum-v0 observation dim = 3; hidden size = 32.
    # Batch many env steps into one call so the kernel does real work.
    # (For production, batch >= 4K rows per call or fuse into the caller;
    #  at these sizes the forward is dispatch-overhead-bound.)
    batch, input_dim, size = 256, 3, 32

    x = jax.random.normal(k_x, (batch, input_dim), jnp.float32)
    w1, b1 = init_linear(k_l1, input_dim, size)
    w2, b2 = init_linear(k_l2, size, size)

    fwd = jax.jit(mlp_forward)
    out = jax.block_until_ready(fwd(x, w1, b1, w2, b2))

    # Pure-JAX reference check of the forward semantics.
    ref = jnp.maximum(jnp.maximum(x @ w1 + b1, 0.0) @ w2 + b2, 0.0)
    assert out.shape == (batch, size)
    assert jnp.allclose(out, ref, atol=1e-5, rtol=1e-5)

    print("KERNEL_OK")
</pallas_src>

<mosaic_0001>
module attributes {stable_mosaic.version = 11 : i64} {
  func.func @mlp_kernel(%arg0: i32, %arg1: memref<256x3xf32, #tpu.memory_space<vmem>>, %arg2: memref<3x32xf32, #tpu.memory_space<vmem>>, %arg3: memref<1x32xf32, #tpu.memory_space<vmem>>, %arg4: memref<32x32xf32, #tpu.memory_space<vmem>>, %arg5: memref<1x32xf32, #tpu.memory_space<vmem>>, %arg6: memref<256x32xf32, #tpu.memory_space<vmem>>) attributes {dimension_semantics = [#tpu.dimension_semantics<parallel>], iteration_bounds = array<i64: 1>, scalar_prefetch = 0 : i64, scratch_operands = 0 : i64, tpu.core_type = #tpu.core_type<tc>, window_params = [{transform_indices = @transform_0, window_bounds = array<i64: 256, 3>}, {pipeline_mode = #tpu.pipeline_mode<synchronous>, transform_indices = @transform_1, window_bounds = array<i64: 3, 32>}, {pipeline_mode = #tpu.pipeline_mode<synchronous>, transform_indices = @transform_2, window_bounds = array<i64: 1, 32>}, {pipeline_mode = #tpu.pipeline_mode<synchronous>, transform_indices = @transform_3, window_bounds = array<i64: 32, 32>}, {pipeline_mode = #tpu.pipeline_mode<synchronous>, transform_indices = @transform_4, window_bounds = array<i64: 1, 32>}, {transform_indices = @transform_5, window_bounds = array<i64: 256, 32>}]} {
    %c0 = arith.constant 0 : index
    %c0_0 = arith.constant 0 : index
    %0 = vector.load %arg1[%c0, %c0_0] : memref<256x3xf32, #tpu.memory_space<vmem>>, vector<256x3xf32>
    %c0_1 = arith.constant 0 : index
    %c0_2 = arith.constant 0 : index
    %1 = vector.load %arg3[%c0_1, %c0_2] : memref<1x32xf32, #tpu.memory_space<vmem>>, vector<1x32xf32>
    %2 = vector.shape_cast %1 : vector<1x32xf32> to vector<1x32xf32>
    %3 = vector.broadcast %2 : vector<1x32xf32> to vector<256x32xf32>
    %4 = vector.extract_strided_slice %0 {offsets = [0, 0], sizes = [256, 1], strides = [1, 1]} : vector<256x3xf32> to vector<256x1xf32>
    %c0_3 = arith.constant 0 : index
    %c0_4 = arith.constant 0 : index
    %5 = vector.load %arg2[%c0_3, %c0_4] : memref<3x32xf32, #tpu.memory_space<vmem>>, vector<1x32xf32>
    %6 = vector.broadcast %4 : vector<256x1xf32> to vector<256x32xf32>
    %7 = vector.broadcast %5 : vector<1x32xf32> to vector<256x32xf32>
    %8 = arith.mulf %6, %7 : vector<256x32xf32>
    %9 = arith.addf %3, %8 : vector<256x32xf32>
    %10 = vector.extract_strided_slice %0 {offsets = [0, 1], sizes = [256, 1], strides = [1, 1]} : vector<256x3xf32> to vector<256x1xf32>
    %c1 = arith.constant 1 : index
    %c0_5 = arith.constant 0 : index
    %11 = vector.load %arg2[%c1, %c0_5] : memref<3x32xf32, #tpu.memory_space<vmem>>, vector<1x32xf32>
    %12 = vector.broadcast %10 : vector<256x1xf32> to vector<256x32xf32>
    %13 = vector.broadcast %11 : vector<1x32xf32> to vector<256x32xf32>
    %14 = arith.mulf %12, %13 : vector<256x32xf32>
    %15 = arith.addf %9, %14 : vector<256x32xf32>
    %16 = vector.extract_strided_slice %0 {offsets = [0, 2], sizes = [256, 1], strides = [1, 1]} : vector<256x3xf32> to vector<256x1xf32>
    %c2 = arith.constant 2 : index
    %c0_6 = arith.constant 0 : index
    %17 = vector.load %arg2[%c2, %c0_6] : memref<3x32xf32, #tpu.memory_space<vmem>>, vector<1x32xf32>
    %18 = vector.broadcast %16 : vector<256x1xf32> to vector<256x32xf32>
    %19 = vector.broadcast %17 : vector<1x32xf32> to vector<256x32xf32>
    %20 = arith.mulf %18, %19 : vector<256x32xf32>
    %21 = arith.addf %15, %20 : vector<256x32xf32>
    %cst = arith.constant 0.000000e+00 : f32
    %22 = vector.broadcast %cst : f32 to vector<256x32xf32>
    %23 = arith.maximumf %21, %22 : vector<256x32xf32>
    %c0_7 = arith.constant 0 : index
    %c0_8 = arith.constant 0 : index
    %24 = vector.load %arg4[%c0_7, %c0_8] : memref<32x32xf32, #tpu.memory_space<vmem>>, vector<32x32xf32>
    %cst_9 = arith.constant dense<0.000000e+00> : vector<256x32xf32>
    %25 = tpu.matmul %23, %24, %cst_9 {dimension_numbers = #tpu.dot_dimension_numbers<[1], [0], [0], [1], [0, 0, 1, 1], [], []>} : vector<256x32xf32>, vector<32x32xf32>, vector<256x32xf32> -> vector<256x32xf32>
    %c0_10 = arith.constant 0 : index
    %c0_11 = arith.constant 0 : index
    %26 = vector.load %arg5[%c0_10, %c0_11] : memref<1x32xf32, #tpu.memory_space<vmem>>, vector<1x32xf32>
    %27 = vector.broadcast %26 : vector<1x32xf32> to vector<256x32xf32>
    %28 = arith.addf %25, %27 : vector<256x32xf32>
    %cst_12 = arith.constant 0.000000e+00 : f32
    %29 = vector.broadcast %cst_12 : f32 to vector<256x32xf32>
    %30 = arith.maximumf %28, %29 : vector<256x32xf32>
    %c0_13 = arith.constant 0 : index
    %c0_14 = arith.constant 0 : index
    %31 = vector.load %arg6[%c0_13, %c0_14] : memref<256x32xf32, #tpu.memory_space<vmem>>, vector<256x32xf32>
    tpu.vector_store %arg6[%c0_13, %c0_14], %30 {strides = array<i32>} : memref<256x32xf32, #tpu.memory_space<vmem>>, vector<256x32xf32>,
    return
  }
  func.func @transform_0(%arg0: i32) -> (i32, i32) {
    %c0_i32 = arith.constant 0 : i32
    %c0_i32_0 = arith.constant 0 : i32
    return %arg0, %c0_i32 : i32, i32
  }
  func.func @transform_1(%arg0: i32) -> (i32, i32) {
    %c0_i32 = arith.constant 0 : i32
    %c0_i32_0 = arith.constant 0 : i32
    %c0_i32_1 = arith.constant 0 : i32
    return %c0_i32, %c0_i32_0 : i32, i32
  }
  func.func @transform_2(%arg0: i32) -> (i32, i32) {
    %c0_i32 = arith.constant 0 : i32
    %c0_i32_0 = arith.constant 0 : i32
    %c0_i32_1 = arith.constant 0 : i32
    return %c0_i32, %c0_i32_0 : i32, i32
  }
  func.func @transform_3(%arg0: i32) -> (i32, i32) {
    %c0_i32 = arith.constant 0 : i32
    %c0_i32_0 = arith.constant 0 : i32
    %c0_i32_1 = arith.constant 0 : i32
    return %c0_i32, %c0_i32_0 : i32, i32
  }
  func.func @transform_4(%arg0: i32) -> (i32, i32) {
    %c0_i32 = arith.constant 0 : i32
    %c0_i32_0 = arith.constant 0 : i32
    %c0_i32_1 = arith.constant 0 : i32
    return %c0_i32, %c0_i32_0 : i32, i32
  }
  func.func @transform_5(%arg0: i32) -> (i32, i32) {
    %c0_i32 = arith.constant 0 : i32
    %c0_i32_0 = arith.constant 0 : i32
    return %arg0, %c0_i32 : i32, i32
  }
}

</mosaic_0001>

<bundles_post_ra>
// kernel: mlp_forward.1
= control target key start
LH: loop header
LB: loop body
LE: loop exit
PB: predicated region body
PF: predicated region fallthrough
CT: control target
= control target key end

     0   :  { %v1300_v0 = vmov 0   ;;  %v1301_v19 = vmov 1   ;;  %v1302_v22 = vmov 2   ;;  %vm725_vm0 = vcmask 261120   ;;  %s2055_s0 = inlined_call_operand.vmem [shape: f32[256,3], index: 0, kind: input, shape index: {}]   ;;  %s2056_s3 = inlined_call_operand.vmem [shape: f32[32,32], index: 3, kind: input, shape index: {}]   ;;  %s2057_s1 = inlined_call_operand.vmem [shape: f32[3,32], index: 1, kind: input, shape index: {}]   ;;  %s2058_s2 = inlined_call_operand.vmem [shape: f32[1,32], index: 2, kind: input, shape index: {}]   ;;  %s2059_s4 = inlined_call_operand.vmem [shape: f32[1,32], index: 4, kind: input, shape index: {}]   ;;  %s2060_s5 = inlined_call_operand.vmem [shape: f32[256,32], index: 5, kind: output, shape index: {}]  }
   0x1   :  { %1260 = vset.pattern.permute.xlu1 %v1300_v0  ;;  %1259 = vset.pattern.permute.xlu0 %v1300_v0  ;;  %v1338_v1 = vld [vmem:[%s2055_s0 + $0x10] sm:$0xff]  ;;  %v1343_v2 = vld [vmem:[%s2055_s0] sm:$0xff]  ;;  %v1350_v3 = vld [vmem:[%s2055_s0 + $0x18] sm:$0xff] }
   0x2   :  { %72 = vperm.xlu1 %1260, %v1338_v1   ;;  %62 = vperm.xlu0 %1259, %v1343_v2   ;;  %v1355_v4 = vld [vmem:[%s2055_s0 + $0x8] sm:$0xff]  ;;  %v1367_v6 = vld [vmem:[%s2055_s0 + $0x20] sm:$0xff]  ;;  %v1374_v7 = vld [vmem:[%s2055_s0 + $0x38] sm:$0xff] }
   0x3   :  { %v1362_v5 = vld [vmem:[%s2055_s0 + $0x28] sm:$0xff]  ;;  %v1379_v8 = vld [vmem:[%s2055_s0 + $0x30] sm:$0xff]  ;;  %v1391_v10 = vld [vmem:[%s2055_s0 + $0x40] sm:$0xff] }
   0x4   :  { %v1386_v9 = vld [vmem:[%s2055_s0 + $0x48] sm:$0xff]  ;;  %v1398_v11 = vld [vmem:[%s2055_s0 + $0x58] sm:$0xff]  ;;  %v1403_v12 = vld [vmem:[%s2055_s0 + $0x50] sm:$0xff] }
   0x5   :  { %v1410_v13 = vld [vmem:[%s2055_s0 + $0x68] sm:$0xff]  ;;  %v1415_v14 = vld [vmem:[%s2055_s0 + $0x60] sm:$0xff]  ;;  %v1422_v15 = vld [vmem:[%s2055_s0 + $0x78] sm:$0xff] }
   0x6   :  { %77 = vperm.xlu1 %1260, %v1350_v3   ;;  %67 = vperm.xlu0 %1259, %v1355_v4   ;;  %v1427_v16 = vld [vmem:[%s2055_s0 + $0x70] sm:$0xff]  ;;  %v37_v17 = vld [vmem:[%s2055_s0 + $0x88] sm:$0xff]  ;;  %v36_v18 = vld [vmem:[%s2055_s0 + $0x80] sm:$0xff] }
   0x7   :  { %v38_v20 = vld [vmem:[%s2055_s0 + $0x90] sm:$0xff]  ;;  %v39_v21 = vld [vmem:[%s2055_s0 + $0x98] sm:$0xff]  ;;  %v1454_v23 = vld [vmem:[%s2055_s0 + $0xa8] sm:$0xff] }
   0x8   :  { %v714_v24 = vld [vmem:[%s2056_s3] sm:$0xff]  ;;  %v715_v25 = vld [vmem:[%s2056_s3 + $0x8] sm:$0xff]  ;;  %v716_v27 = vld [vmem:[%s2056_s3 + $0x10] sm:$0xff] }
   0x9   :  { %v1244_v26 = vpack.c.bf16 %v715_v25, %v714_v24  ;;  %v717_v28 = vld [vmem:[%s2056_s3 + $0x18] sm:$0xff]  ;;  %v1484_v31 = vld [vmem:[%s2055_s0 + $0xc8] sm:$0xff]  ;;  %v40_v32 = vld [vmem:[%s2055_s0 + $0xa0] sm:$0xff] }
   0xa   :  { %87 = vperm.xlu1 %1260, %v1362_v5   ;;  %82 = vperm.xlu0 %1259, %v1367_v6   ;;  %v1248_v29 = vpack.c.bf16 %v717_v28, %v716_v27  ;;  %v1475_v30 = vld [vmem:[%s2055_s0 + $0xb8] sm:$0xff]  ;;  %v1505_v34 = vld [vmem:[%s2055_s0 + $0xe8] sm:$0xff]  ;;  %v42_v36 = vld [vmem:[%s2055_s0 + $0xb0] sm:$0xff] }
   0xb   :  { %1252 = vmatprep.subr.bf16.mxu1 %v1244_v26  ;;  %1245 = vmatprep.subr.bf16.mxu0 %v1244_v26  ;;  %v1495_v33 = vld [vmem:[%s2055_s0 + $0xd8] sm:$0xff]  ;;  %v44_v39 = vld [vmem:[%s2055_s0 + $0xc0] sm:$0xff]  ;;  %v1589_v54 = vld [vmem:[%s2055_s0 + $0xf0] sm:$0xff] }
   0xc   :  { %1254 = vmatpush3.bf16.msra.mxu1 %v1244_v26  ;;  %1247 = vmatpush3.bf16.msra.mxu0 %v1244_v26  ;;  %v1514_v35 = vld [vmem:[%s2055_s0 + $0xf8] sm:$0xff]  ;;  %v46_v57 = vld [vmem:[%s2055_s0 + $0xd0] sm:$0xff]  ;;  %v1605_v62 = vld [vmem:[%s2057_s1] ss:$0 sm:$0xff] }
   0xd   :  { %1253 = vmatprep.subr.bf16.mxu1 %v1248_v29  ;;  %1249 = vmatprep.subr.bf16.mxu0 %v1248_v29  ;;  %v1649_v28 = vld [vmem:[%s2055_s0 + $0xe0] sm:$0xff] }
   0xe   :  { %97 = vperm.xlu1 %1260, %v1374_v7   ;;  %92 = vperm.xlu0 %1259, %v1379_v8  }
  0x10   :  { %1255 = vmatpush3.bf16.msra.mxu1 %v1248_v29  ;;  %1251 = vmatpush3.bf16.msra.mxu0 %v1248_v29 }
  0x12   :  { %107 = vperm.xlu1 %1260, %v1386_v9   ;;  %102 = vperm.xlu0 %1259, %v1391_v10  }
  0x16   :  { %117 = vperm.xlu1 %1260, %v1398_v11   ;;  %112 = vperm.xlu0 %1259, %v1403_v12  }
  0x1a   :  { %127 = vperm.xlu1 %1260, %v1410_v13   ;;  %122 = vperm.xlu0 %1259, %v1415_v14  }
  0x1e   :  { %137 = vperm.xlu1 %1260, %v1422_v15   ;;  %132 = vperm.xlu0 %1259, %v1427_v16  }
  0x22   :  { %147 = vperm.xlu1 %1260, %v37_v17   ;;  %142 = vperm.xlu0 %1259, %v36_v18  }
  0x26   :  { %1262 = vset.pattern.permute.xlu1 %v1301_v19  ;;  %1261 = vset.pattern.permute.xlu0 %v1301_v19 }
  0x27   :  { %354 = vperm.xlu1 %1262, %v36_v18   ;;  %290 = vperm.xlu0 %1261, %v1343_v2  }
  0x2b   :  { %294 = vperm.xlu1 %1262, %v1355_v4   ;;  %358 = vperm.xlu0 %1261, %v37_v17  }
  0x2f   :  { %1263 = vset.pattern.permute.xlu1 %v1300_v0  ;;  %298 = vperm.xlu0 %1261, %v1338_v1  }
  0x30   :  { %152 = vperm.xlu1 %1263, %v38_v20  }
  0x33   :  { %366 = vperm.xlu0 %1261, %v39_v21  }
  0x34   :  { %1264 = vset.pattern.permute.xlu1 %v1302_v22 }
  0x35   :  { %551 = vperm.xlu1 %1264, %v36_v18  }
  0x37   :  { %306 = vperm.xlu0 %1261, %v1367_v6  }
  0x39   :  { %1265 = vset.pattern.permute.xlu1 %v1300_v0 }
  0x3a   :  { %157 = vperm.xlu1 %1265, %v39_v21  }
  0x3b   :  { %374 = vperm.xlu0 %1261, %v1454_v23  }
  0x3e   :  { %1266 = vset.pattern.permute.xlu1 %v1302_v22 }
  0x3f   :  { %555 = vperm.xlu1 %1266, %v37_v17   ;;  %314 = vperm.xlu0 %1261, %v1379_v8  }
  0x43   :  { %1267 = vset.pattern.permute.xlu1 %v1301_v19  ;;  %382 = vperm.xlu0 %1261, %v1475_v30  }
  0x44   :  { %362 = vperm.xlu1 %1267, %v38_v20  }
  0x47   :  { %322 = vperm.xlu0 %1261, %v1391_v10  }
  0x48   :  { %302 = vperm.xlu1 %1267, %v1350_v3  }
  0x4b   :  { %390 = vperm.xlu0 %1261, %v1484_v31  }
  0x4c   :  { %1268 = vset.pattern.permute.xlu1 %v1300_v0 }
  0x4d   :  { %162 = vperm.xlu1 %1268, %v40_v32  }
  0x4f   :  { %330 = vperm.xlu0 %1261, %v1403_v12  }
  0x51   :  { %1269 = vset.pattern.permute.xlu1 %v1302_v22 }
  0x52   :  { %559 = vperm.xlu1 %1269, %v38_v20  }
  0x53   :  { %398 = vperm.xlu0 %1261, %v1495_v33  }
  0x56   :  { %1270 = vset.pattern.permute.xlu1 %v1300_v0 }
  0x57   :  { %167 = vperm.xlu1 %1270, %v1454_v23   ;;  %338 = vperm.xlu0 %1261, %v1415_v14  }
  0x5b   :  { %1271 = vset.pattern.permute.xlu1 %v1302_v22  ;;  %406 = vperm.xlu0 %1261, %v1505_v34  }
  0x5c   :  { %563 = vperm.xlu1 %1271, %v39_v21  }
  0x5f   :  { %346 = vperm.xlu0 %1261, %v1427_v16  }
  0x60   :  { %1272 = vset.pattern.permute.xlu1 %v1301_v19 }
  0x61   :  { %370 = vperm.xlu1 %1272, %v40_v32  }
  0x63   :  { %414 = vperm.xlu0 %1261, %v1514_v35  }
  0x65   :  { %310 = vperm.xlu1 %1272, %v1362_v5  }
  0x67   :  { %1298 = vset.pattern.permute.xlu0 %v1302_v22 }
  0x68   :  { %487 = vperm.xlu0 %1298, %v1343_v2  }
  0x69   :  { %1273 = vset.pattern.permute.xlu1 %v1300_v0 }
  0x6a   :  { %172 = vperm.xlu1 %1273, %v42_v36  }
  0x6c   :  { %491 = vperm.xlu0 %1298, %v1355_v4   ;;  %v1620_v4 = vld [vmem:[%s2058_s2] ss:$0 sm:$0xff] }
  0x6e   :  { %1274 = vset.pattern.permute.xlu1 %v1302_v22 }
  0x6f   :  { %567 = vperm.xlu1 %1274, %v40_v32  }
  0x70   :  { %495 = vperm.xlu0 %1298, %v1338_v1   ;;  %v1612_v1 = vld [vmem:[%s2057_s1 + $0x1] ss:$0 sm:$0xff] }
  0x73   :  { %1275 = vset.pattern.permute.xlu1 %v1300_v0 }
  0x74   :  { %177 = vperm.xlu1 %1275, %v1475_v30   ;;  %499 = vperm.xlu0 %1298, %v1350_v3  }
  0x78   :  { %1276 = vset.pattern.permute.xlu1 %v1302_v22  ;;  %503 = vperm.xlu0 %1298, %v1367_v6  }
  0x79   :  { %571 = vperm.xlu1 %1276, %v1454_v23  }
  0x7c   :  { %507 = vperm.xlu0 %1298, %v1362_v5  }
  0x7d   :  { %1277 = vset.pattern.permute.xlu1 %v1301_v19 }
  0x7e   :  { %378 = vperm.xlu1 %1277, %v42_v36  }
  0x80   :  { %511 = vperm.xlu0 %1298, %v1379_v8   ;;  %v1630_v8 = vld [vmem:[%s2057_s1 + $0x2] ss:$0 sm:$0xff] }
  0x81   :  { %v1536_v37 = vpop.permute.xlu1 %72  ;;  %v1538_v38 = vpop.permute.xlu0 %62 }
  0x82   :  { %318 = vperm.xlu1 %1277, %v1374_v7  }
  0x84   :  { %515 = vperm.xlu0 %1298, %v1374_v7  }
  0x85   :  { %v1545_v40 = vpop.permute.xlu1 %77  ;;  %v1547_v41 = vpop.permute.xlu0 %67 }
  0x86   :  { %1278 = vset.pattern.permute.xlu1 %v1300_v0 }
  0x87   :  { %182 = vperm.xlu1 %1278, %v44_v39  }
  0x88   :  { %519 = vperm.xlu0 %1298, %v1391_v10  }
  0x89   :  { %v1551_v42 = vpop.permute.xlu1 %87  ;;  %v1553_v43 = vpop.permute.xlu0 %82 }
  0x8b   :  { %1279 = vset.pattern.permute.xlu1 %v1302_v22 }
  0x8c   :  { %575 = vperm.xlu1 %1279, %v42_v36   ;;  %523 = vperm.xlu0 %1298, %v1386_v9  }
  0x8d   :  { %v1557_v44 = vpop.permute.xlu1 %97  ;;  %v1559_v45 = vpop.permute.xlu0 %92 }
  0x90   :  { %1280 = vset.pattern.permute.xlu1 %v1300_v0  ;;  %527 = vperm.xlu0 %1298, %v1403_v12  }
  0x91   :  { %v1563_v46 = vpop.permute.xlu1 %107  ;;  %187 = vperm.xlu1 %1280, %v1484_v31   ;;  %v1566_v47 = vpop.permute.xlu0 %102 }
  0x94   :  { %531 = vperm.xlu0 %1298, %v1398_v11  }
  0x95   :  { %v1569_v48 = vpop.permute.xlu1 %117  ;;  %1281 = vset.pattern.permute.xlu1 %v1302_v22  ;;  %v1572_v49 = vpop.permute.xlu0 %112 }
  0x96   :  { %579 = vperm.xlu1 %1281, %v1475_v30  }
  0x98   :  { %535 = vperm.xlu0 %1298, %v1415_v14  }
  0x99   :  { %v1576_v50 = vpop.permute.xlu1 %127  ;;  %v1578_v51 = vpop.permute.xlu0 %122 }
  0x9a   :  { %1282 = vset.pattern.permute.xlu1 %v1301_v19 }
  0x9b   :  { %386 = vperm.xlu1 %1282, %v44_v39  }
  0x9c   :  { %539 = vperm.xlu0 %1298, %v1410_v13  }
  0x9d   :  { %v1582_v52 = vpop.permute.xlu1 %137  ;;  %v1584_v53 = vpop.permute.xlu0 %132 }
  0x9f   :  { %326 = vperm.xlu1 %1282, %v1386_v9  }
  0xa0   :  { %607 = vperm.xlu0 %1298, %v1589_v54  }
  0xa1   :  { %v148_v55 = vpop.permute.xlu1 %147  ;;  %v143_v56 = vpop.permute.xlu0 %142 }
  0xa2   :  { %v240_v63 = vmul.f32 %v1605_v62, %v143_v56  ;;  %v241_v18 = vmul.f32 %v1605_v62, %v148_v55  ;;  %v234_v56 = vmul.f32 %v1605_v62, %v1572_v49 }
  0xa3   :  { %1283 = vset.pattern.permute.xlu1 %v1300_v0 }
  0xa4   :  { %192 = vperm.xlu1 %1283, %v46_v57   ;;  %v272_v5 = vadd.f32 %v1620_v4, %v240_v63  ;;  %v273_v25 = vadd.f32 %v1620_v4, %v241_v18 }
  0xa6   :  { %v355_v58 = vpop.permute.xlu1 %354  ;;  %v1597_v59 = vpop.permute.xlu0 %290 }
  0xa7   :  { %v437_v6 = vmul.f32 %v1612_v1, %v355_v58 }
  0xa8   :  { %1284 = vset.pattern.permute.xlu1 %v1302_v22 }
  0xa9   :  { %583 = vperm.xlu1 %1284, %v44_v39   ;;  %v469_v10 = vadd.f32 %v437_v6, %v272_v5  ;;  %v266_v5 = vadd.f32 %v1620_v4, %v234_v56 }
  0xaa   :  { %v1600_v60 = vpop.permute.xlu1 %294  ;;  %v359_v61 = vpop.permute.xlu0 %358 }
  0xab   :  { %v438_v24 = vmul.f32 %v1612_v1, %v359_v61 }
  0xad   :  { %1285 = vset.pattern.permute.xlu1 %v1300_v0  ;;  %v470_v29 = vadd.f32 %v438_v24, %v273_v25 }
  0xae   :  { %197 = vperm.xlu1 %1285, %v1495_v33   ;;  %v1615_v2 = vpop.permute.xlu0 %298 }
  0xaf   :  { %v153_v3 = vpop.permute.xlu1 %152 }
  0xb0   :  { %v242_v61 = vmul.f32 %v1605_v62, %v153_v3 }
  0xb2   :  { %1286 = vset.pattern.permute.xlu1 %v1302_v22  ;;  %v1625_v7 = vpop.permute.xlu0 %366  ;;  %v274_v49 = vadd.f32 %v1620_v4, %v242_v61 }
  0xb3   :  { %587 = vperm.xlu1 %1286, %v1484_v31  }
  0xb4   :  { %v552_v9 = vpop.permute.xlu1 %551 }
  0xb5   :  { %v634_v12 = vmul.f32 %v1630_v8, %v552_v9 }
  0xb6   :  { %v1634_v14 = vpop.permute.xlu0 %306 }
  0xb7   :  { %1287 = vset.pattern.permute.xlu1 %v1301_v19  ;;  %v666_v17 = vadd.f32 %v634_v12, %v469_v10  ;;  %v236_v10 = vmul.f32 %v1605_v62, %v1578_v51 }
  0xb8   :  { %394 = vperm.xlu1 %1287, %v46_v57  }
  0xb9   :  { %v158_v20 = vpop.permute.xlu1 %157  ;;  %v698_v21 = vmax.f32 %v666_v17, 0.0 }
  0xba   :  { %v1638_v23 = vpop.permute.xlu0 %374  ;;  %v243_v24 = vmul.f32 %v1605_v62, %v158_v20  ;;  %v238_v20 = vmul.f32 %v1605_v62, %v1584_v53 }
  0xbb   :  { %1220 = vmatprep.mubr.msk.f32.mxu1 %vm725_vm0, %v698_v21 }
  0xbc   :  { %334 = vperm.xlu1 %1287, %v1398_v11  }
  0xbe   :  { %v556_v26 = vpop.permute.xlu1 %555  ;;  %v1644_v27 = vpop.permute.xlu0 %314 }
  0xbf   :  { %v635_v30 = vmul.f32 %v1630_v8, %v556_v26  ;;  %v268_v26 = vadd.f32 %v1620_v4, %v236_v10 }
  0xc0   :  { %1288 = vset.pattern.permute.xlu1 %v1300_v0 }
  0xc1   :  { %v667_v31 = vadd.f32 %v635_v30, %v470_v29  ;;  %202 = vperm.xlu1 %1288, %v1649_v28  }
  0xc2   :  { %v1654_v32 = vpop.permute.xlu0 %382 }
  0xc3   :  { %v699_v11 = vmax.f32 %v667_v31, 0.0  ;;  %v363_v36 = vpop.permute.xlu1 %362  ;;  %v440_v31 = vmul.f32 %v1612_v1, %v1625_v7  ;;  %v224_v7 = vmul.f32 %v1605_v62, %v1538_v38 }
  0xc5   :  { %1289 = vset.pattern.permute.xlu1 %v1302_v22  ;;  %1221 = vmatmul.mubr.msk.f32.vlgmr.msra.gmra.mrb[0].mxu1 %vm725_vm0, %v699_v11  ;;  %v275_v11 = vadd.f32 %v1620_v4, %v243_v24  ;;  %v225_v24 = vmul.f32 %v1605_v62, %v1547_v41  ;;  %v226_v41 = vmul.f32 %v1605_v62, %v1536_v37 }
  0xc6   :  { %591 = vperm.xlu1 %1289, %v46_v57   ;;  %v1658_v39 = vpop.permute.xlu0 %322  ;;  %v439_v57 = vmul.f32 %v1612_v1, %v363_v36  ;;  %v227_v37 = vmul.f32 %v1605_v62, %v1545_v40 }
  0xc7   :  { %v1660_v55 = vpop.permute.xlu1 %302 }
  0xc8   :  { %v471_v17 = vadd.f32 %v439_v57, %v274_v49 }
  0xca   :  { %1290 = vset.pattern.permute.xlu1 %v1300_v0  ;;  %v1665_v58 = vpop.permute.xlu0 %390 }
  0xcb   :  { %207 = vperm.xlu1 %1290, %v1505_v34  }
  0xcc   :  { %v163_v63 = vpop.permute.xlu1 %162 }
  0xce   :  { %v331_v6 = vpop.permute.xlu0 %330 }
  0xcf   :  { %1291 = vset.pattern.permute.xlu1 %v1302_v22  ;;  %v431_v9 = vmul.f32 %v1612_v1, %v331_v6  ;;  %v270_v6 = vadd.f32 %v1620_v4, %v238_v20 }
  0xd0   :  { %595 = vperm.xlu1 %1291, %v1495_v33  }
  0xd1   :  { %v1677_v12 = vadd.f32 %v431_v9, %v266_v5  ;;  %v560_v3 = vpop.permute.xlu1 %559  ;;  %v472_v5 = vadd.f32 %v440_v31, %v275_v11  ;;  %v244_v31 = vmul.f32 %v1605_v62, %v163_v63 }
  0xd2   :  { %v636_v18 = vmul.f32 %v1630_v8, %v560_v3  ;;  %v1680_v21 = vpop.permute.xlu0 %398 }
  0xd3   :  { %v276_v63 = vadd.f32 %v1620_v4, %v244_v31 }
  0xd4   :  { %v668_v25 = vadd.f32 %v636_v18, %v471_v17  ;;  %1292 = vset.pattern.permute.xlu1 %v1301_v19  ;;  %v256_v17 = vadd.f32 %v1620_v4, %v224_v7  ;;  %v421_v18 = vmul.f32 %v1612_v1, %v1597_v59  ;;  %v422_v59 = vmul.f32 %v1612_v1, %v1600_v60 }
  0xd5   :  { %402 = vperm.xlu1 %1292, %v1649_v28  }
  0xd6   :  { %v700_v33 = vmax.f32 %v668_v25, 0.0  ;;  %v1686_v29 = vpop.permute.xlu1 %167  ;;  %v339_v51 = vpop.permute.xlu0 %338 }
  0xd7   :  { %v433_v30 = vmul.f32 %v1612_v1, %v339_v51  ;;  %v257_v51 = vadd.f32 %v1620_v4, %v225_v24  ;;  %v245_v40 = vmul.f32 %v1605_v62, %v1686_v29 }
  0xd8   :  { %1223 = vmatprep.mubr.msk.f32.mxu1 %vm725_vm0, %v700_v33 }
  0xd9   :  { %v1695_v36 = vadd.f32 %v433_v30, %v268_v26  ;;  %342 = vperm.xlu1 %1292, %v1410_v13   ;;  %v453_v26 = vadd.f32 %v421_v18, %v256_v17 }
  0xda   :  { %v1698_v56 = vpop.permute.xlu0 %406 }
  0xdb   :  { %v564_v61 = vpop.permute.xlu1 %563 }
  0xdc   :  { %v637_v57 = vmul.f32 %v1630_v8, %v564_v61  ;;  %v454_v61 = vadd.f32 %v422_v59, %v257_v51 }
  0xdd   :  { %1293 = vset.pattern.permute.xlu1 %v1300_v0 }
  0xde   :  { %v669_v9 = vadd.f32 %v637_v57, %v472_v5  ;;  %212 = vperm.xlu1 %1293, %v1589_v54   ;;  %v347_v53 = vpop.permute.xlu0 %346  ;;  %v423_v5 = vmul.f32 %v1612_v1, %v1615_v2  ;;  %v228_v2 = vmul.f32 %v1605_v62, %v1553_v43 }
  0xdf   :  { %v435_v49 = vmul.f32 %v1612_v1, %v347_v53 }
  0xe0   :  { %v701_v13 = vmax.f32 %v669_v9, 0.0  ;;  %v371_v10 = vpop.permute.xlu1 %370 }
  0xe1   :  { %v1707_v3 = vadd.f32 %v435_v49, %v270_v6  ;;  %v258_v6 = vadd.f32 %v1620_v4, %v226_v41  ;;  %v442_v41 = vmul.f32 %v1612_v1, %v1638_v23 }
  0xe2   :  { %1294 = vset.pattern.permute.xlu1 %v1302_v22  ;;  %1224 = vmatmul.mubr.msk.f32.gmra.mrb[2].mxu1 %vm725_vm0, %v701_v13  ;;  %v1714_v38 = vpop.permute.xlu0 %414 }
  0xe3   :  { %599 = vperm.xlu1 %1294, %v1649_v28  }
  0xe4   :  { %v311_v25 = vpop.permute.xlu1 %310 }
  0xe7   :  { %1295 = vset.pattern.permute.xlu1 %v1300_v0  ;;  %v488_v33 = vpop.permute.xlu0 %487  ;;  %v441_v0 = vmul.f32 %v1612_v1, %v371_v10  ;;  %v455_v10 = vadd.f32 %v423_v5, %v258_v6  ;;  %v426_v5 = vmul.f32 %v1612_v1, %v311_v25 }
  0xe8   :  { %v618_v30 = vmul.f32 %v1630_v8, %v488_v33  ;;  %217 = vperm.xlu1 %1295, %v1514_v35   ;;  %v260_v33 = vadd.f32 %v1620_v4, %v228_v2 }
  0xe9   :  { %v1726_v28 = vpop.permute.xlu1 %172  ;;  %v473_v53 = vadd.f32 %v441_v0, %v276_v63 }
  0xea   :  { %v650_v11 = vadd.f32 %v618_v30, %v453_v26  ;;  %v259_v26 = vadd.f32 %v1620_v4, %v227_v37  ;;  %v425_v30 = vmul.f32 %v1612_v1, %v1634_v14  ;;  %v230_v14 = vmul.f32 %v1605_v62, %v1559_v45 }
  0xeb   :  { %v492_v20 = vpop.permute.xlu0 %491 }
  0xec   :  { %v619_v60 = vmul.f32 %v1630_v8, %v492_v20  ;;  %1296 = vset.pattern.permute.xlu1 %v1302_v22  ;;  %v682_v57 = vmax.f32 %v650_v11, 0.0  ;;  %v229_v11 = vmul.f32 %v1605_v62, %v1551_v42  ;;  %v262_v45 = vadd.f32 %v1620_v4, %v230_v14 }
  0xed   :  { %603 = vperm.xlu1 %1296, %v1505_v34   ;;  %v424_v34 = vmul.f32 %v1612_v1, %v1660_v55 }
  0xee   :  { %v651_v7 = vadd.f32 %v619_v60, %v454_v61  ;;  %v568_v9 = vpop.permute.xlu1 %567  ;;  %1196 = vmatprep.mubr.msk.f32.mxu0 %vm725_vm0, %v682_v57  ;;  %v457_v61 = vadd.f32 %v425_v30, %v260_v33  ;;  %v261_v42 = vadd.f32 %v1620_v4, %v229_v11 }
  0xef   :  { %v638_v49 = vmul.f32 %v1630_v8, %v568_v9  ;;  %v496_v13 = vpop.permute.xlu0 %495  ;;  %v456_v29 = vadd.f32 %v424_v34, %v259_v26  ;;  %v427_v9 = vmul.f32 %v1612_v1, %v1644_v27 }
  0xf0   :  { %v683_v17 = vmax.f32 %v651_v7, 0.0  ;;  %v620_v18 = vmul.f32 %v1630_v8, %v496_v13  ;;  %v458_v2 = vadd.f32 %v426_v5, %v261_v42 }
  0xf1   :  { %v670_v24 = vadd.f32 %v638_v49, %v473_v53  ;;  %1297 = vset.pattern.permute.xlu1 %v1301_v19  ;;  %v459_v27 = vadd.f32 %v427_v9, %v262_v45 }
  0xf2   :  { %v652_v43 = vadd.f32 %v620_v18, %v455_v10  ;;  %410 = vperm.xlu1 %1297, %v1589_v54   ;;  %1197 = vmatmul.mubr.msk.f32.vlgmr.msra.gmra.mrb[0].mxu0 %vm725_vm0, %v683_v17  ;;  %v277_v54 = vadd.f32 %v1620_v4, %v245_v40  ;;  %v232_v17 = vmul.f32 %v1605_v62, %v1566_v47 }
  0xf3   :  { %v702_v51 = vmax.f32 %v670_v24, 0.0  ;;  %v1754_v55 = vpop.permute.xlu1 %177  ;;  %v500_v59 = vpop.permute.xlu0 %499  ;;  %v429_v47 = vmul.f32 %v1612_v1, %v1658_v39 }
  0xf4   :  { %v684_v31 = vmax.f32 %v652_v43, 0.0  ;;  %v621_v19 = vmul.f32 %v1630_v8, %v500_v59  ;;  %v474_v63 = vadd.f32 %v442_v41, %v277_v54  ;;  %v264_v33 = vadd.f32 %v1620_v4, %v232_v17 }
  0xf5   :  { %1226 = vmatprep.mubr.msk.f32.mxu1 %vm725_vm0, %v702_v51 }
  0xf6   :  { %v653_v0 = vadd.f32 %v621_v19, %v456_v29  ;;  %350 = vperm.xlu1 %1297, %v1422_v15   ;;  %1199 = vmatprep.mubr.msk.f32.mxu0 %vm725_vm0, %v684_v31  ;;  %v246_v29 = vmul.f32 %v1605_v62, %v1726_v28  ;;  %v461_v54 = vadd.f32 %v429_v47, %v264_v33 }
  0xf7   :  { %v504_v20 = vpop.permute.xlu0 %503 }
  0xf8   :  { %v685_v23 = vmax.f32 %v653_v0, 0.0  ;;  %v622_v60 = vmul.f32 %v1630_v8, %v504_v20  ;;  %v572_v57 = vpop.permute.xlu1 %571  ;;  %v278_v39 = vadd.f32 %v1620_v4, %v246_v29  ;;  %v446_v29 = vmul.f32 %v1612_v1, %v1665_v58 }
  0xf9   :  { %v639_v6 = vmul.f32 %v1630_v8, %v572_v57 }
  0xfa   :  { %v654_v37 = vadd.f32 %v622_v60, %v457_v61  ;;  %1299 = vset.pattern.permute.xlu1 %v1302_v22  ;;  %1200 = vmatmul.mubr.msk.f32.gmra.mrb[2].mxu0 %vm725_vm0, %v685_v23  ;;  %v231_v22 = vmul.f32 %v1605_v62, %v1557_v44  ;;  %v247_v23 = vmul.f32 %v1605_v62, %v1754_v55 }
  0xfb   :  { %v671_v7 = vadd.f32 %v639_v6, %v474_v63  ;;  %543 = vperm.xlu1 %1299, %v1427_v16   ;;  %v508_v25 = vpop.permute.xlu0 %507  ;;  %v444_v6 = vmul.f32 %v1612_v1, %v1654_v32 }
  0xfc   :  { %v686_v53 = vmax.f32 %v654_v37, 0.0  ;;  %v623_v49 = vmul.f32 %v1630_v8, %v508_v25  ;;  %v263_v26 = vadd.f32 %v1620_v4, %v231_v22  ;;  %v279_v42 = vadd.f32 %v1620_v4, %v247_v23 }
  0xfd   :  { %v703_v13 = vmax.f32 %v671_v7, 0.0  ;;  %v379_v10 = vpop.permute.xlu1 %378 }
  0xfe   :  { %v655_v34 = vadd.f32 %v623_v49, %v458_v2  ;;  %1202 = vmatprep.mubr.msk.f32.mxu0 %vm725_vm0, %v686_v53  ;;  %v443_v11 = vmul.f32 %v1612_v1, %v379_v10  ;;  %v476_v7 = vadd.f32 %v444_v6, %v279_v42  ;;  %v233_v53 = vmul.f32 %v1605_v62, %v1563_v46 }
  0xff   :  { %547 = vperm.xlu1 %1299, %v1422_v15   ;;  %1227 = vmatmul.mubr.msk.f32.gmra.mrb[4].mxu1 %vm725_vm0, %v703_v13  ;;  %v512_v16 = vpop.permute.xlu0 %511 }
 0x100   :  { %v687_v18 = vmax.f32 %v655_v34, 0.0  ;;  %v624_v40 = vmul.f32 %v1630_v8, %v512_v16  ;;  %v475_v61 = vadd.f32 %v443_v11, %v278_v39  ;;  %v265_v10 = vadd.f32 %v1620_v4, %v233_v53 }
 0x101   :  { %v319_v24 = vpop.permute.xlu1 %318  ;;  %v235_v39 = vmul.f32 %v1605_v62, %v1569_v48 }
 0x102   :  { %v656_v43 = vadd.f32 %v624_v40, %v459_v27  ;;  %v428_v44 = vmul.f32 %v1612_v1, %v319_v24  ;;  %1203 = vmatmul.mubr.msk.f32.gmra.mrb[4].mxu0 %vm725_vm0, %v687_v18 }
 0x103   :  { %611 = vperm.xlu1 %1299, %v1514_v35   ;;  %v516_v15 = vpop.permute.xlu0 %515 }
 0x104   :  { %v688_v51 = vmax.f32 %v656_v43, 0.0  ;;  %v460_v59 = vadd.f32 %v428_v44, %v263_v26  ;;  %v625_v30 = vmul.f32 %v1630_v8, %v516_v15 }
 0x106   :  { %v657_v31 = vadd.f32 %v625_v30, %v460_v59  ;;  %v183_v19 = vpop.permute.xlu1 %182  ;;  %1205 = vmatprep.mubr.msk.f32.mxu0 %vm725_vm0, %v688_v51 }
 0x107   :  { %v520_v41 = vpop.permute.xlu0 %519  ;;  %v248_v27 = vmul.f32 %v1605_v62, %v183_v19 }
 0x108   :  { %v689_v35 = vmax.f32 %v657_v31, 0.0  ;;  %v626_v0 = vmul.f32 %v1630_v8, %v520_v41 }
 0x109   :  { %v280_v43 = vadd.f32 %v1620_v4, %v248_v27  ;;  %v237_v27 = vmul.f32 %v1605_v62, %v1576_v50 }
 0x10a   :  { %v658_v14 = vadd.f32 %v626_v0, %v461_v54  ;;  %1206 = vmatmul.mubr.msk.f32.gmra.mrb[6].mxu0 %vm725_vm0, %v689_v35 }
 0x10b   :  { %v576_v20 = vpop.permute.xlu1 %575  ;;  %v524_v37 = vpop.permute.xlu0 %523 }
 0x10c   :  { %v690_v5 = vmax.f32 %v658_v14, 0.0  ;;  %v640_v28 = vmul.f32 %v1630_v8, %v576_v20  ;;  %v627_v22 = vmul.f32 %v1630_v8, %v524_v37 }
 0x10e   :  { %v672_v60 = vadd.f32 %v640_v28, %v475_v61  ;;  %1208 = vmatprep.mubr.msk.f32.mxu0 %vm725_vm0, %v690_v5  ;;  %v267_v5 = vadd.f32 %v1620_v4, %v235_v39 }
 0x10f   :  { %v528_v49 = vpop.permute.xlu0 %527 }
 0x110   :  { %v704_v57 = vmax.f32 %v672_v60, 0.0  ;;  %v188_v63 = vpop.permute.xlu1 %187  ;;  %v628_v32 = vmul.f32 %v1630_v8, %v528_v49 }
 0x112   :  { %1229 = vmatprep.mubr.msk.f32.mxu1 %vm725_vm0, %v704_v57  ;;  %v660_v16 = vadd.f32 %v628_v32, %v1677_v12  ;;  %v249_v12 = vmul.f32 %v1605_v62, %v188_v63  ;;  %v448_v32 = vmul.f32 %v1612_v1, %v1680_v21 }
 0x113   :  { %v532_v31 = vpop.permute.xlu0 %531 }
 0x114   :  { %v692_v26 = vmax.f32 %v660_v16, 0.0  ;;  %v281_v30 = vadd.f32 %v1620_v4, %v249_v12  ;;  %v629_v58 = vmul.f32 %v1630_v8, %v532_v31 }
 0x115   :  { %v580_v45 = vpop.permute.xlu1 %579 }
 0x116   :  { %v641_v25 = vmul.f32 %v1630_v8, %v580_v45  ;;  %v478_v41 = vadd.f32 %v446_v29, %v281_v30 }
 0x117   :  { %v536_v14 = vpop.permute.xlu0 %535 }
 0x118   :  { %v673_v9 = vadd.f32 %v641_v25, %v476_v7  ;;  %v630_v20 = vmul.f32 %v1630_v8, %v536_v14 }
 0x11a   :  { %v705_v2 = vmax.f32 %v673_v9, 0.0  ;;  %v387_v55 = vpop.permute.xlu1 %386  ;;  %v662_v60 = vadd.f32 %v630_v20, %v1695_v36 }
 0x11b   :  { %v445_v46 = vmul.f32 %v1612_v1, %v387_v55 }
 0x11c   :  { %1230 = vmatmul.mubr.msk.f32.gmra.mrb[6].mxu1 %vm725_vm0, %v705_v2  ;;  %v694_v37 = vmax.f32 %v662_v60, 0.0 }
 0x11d   :  { %v477_v33 = vadd.f32 %v445_v46, %v280_v43 }
 0x11e   :  { %v327_v13 = vpop.permute.xlu1 %326 }
 0x11f   :  { %v430_v34 = vmul.f32 %v1612_v1, %v327_v13 }
 0x121   :  { %v462_v17 = vadd.f32 %v430_v34, %v265_v10 }
 0x123   :  { %v659_v18 = vadd.f32 %v627_v22, %v462_v17  ;;  %v193_v40 = vpop.permute.xlu1 %192 }
 0x124   :  { %v250_v57 = vmul.f32 %v1605_v62, %v193_v40  ;;  %v269_v40 = vadd.f32 %v1620_v4, %v237_v27 }
 0x125   :  { %v691_v24 = vmax.f32 %v659_v18, 0.0 }
 0x126   :  { %v282_v45 = vadd.f32 %v1620_v4, %v250_v57 }
 0x127   :  { %1209 = vmatmul.mubr.msk.f32.gmra.mrb[8].mxu0 %vm725_vm0, %v691_v24  ;;  %v540_v24 = vpop.permute.xlu0 %539 }
 0x128   :  { %v584_v44 = vpop.permute.xlu1 %583  ;;  %1211 = vmatprep.mubr.msk.f32.mxu0 %vm725_vm0, %v692_v26  ;;  %v631_v21 = vmul.f32 %v1630_v8, %v540_v24 }
 0x129   :  { %v642_v15 = vmul.f32 %v1630_v8, %v584_v44 }
 0x12b   :  { %v674_v47 = vadd.f32 %v642_v15, %v477_v33  ;;  %v608_v20 = vpop.permute.xlu0 %607 }
 0x12d   :  { %v706_v51 = vmax.f32 %v674_v47, 0.0  ;;  %v198_v59 = vpop.permute.xlu1 %197 }
 0x12e   :  { %v251_v36 = vmul.f32 %v1605_v62, %v198_v59 }
 0x12f   :  { %1232 = vmatprep.mubr.msk.f32.mxu1 %vm725_vm0, %v706_v51 }
 0x130   :  { %v283_v49 = vadd.f32 %v1620_v4, %v251_v36 }
 0x132   :  { %v588_v19 = vpop.permute.xlu1 %587  ;;  %v480_v10 = vadd.f32 %v448_v32, %v283_v49 }
 0x133   :  { %v643_v54 = vmul.f32 %v1630_v8, %v588_v19 }
 0x135   :  { %v675_v11 = vadd.f32 %v643_v54, %v478_v41  ;;  %v450_v54 = vmul.f32 %v1612_v1, %v1698_v56 }
 0x137   :  { %v707_v35 = vmax.f32 %v675_v11, 0.0  ;;  %v395_v0 = vpop.permute.xlu1 %394 }
 0x138   :  { %v447_v48 = vmul.f32 %v1612_v1, %v395_v0 }
 0x139   :  { %1233 = vmatmul.mubr.msk.f32.gmra.mrb[8].mxu1 %vm725_vm0, %v707_v35 }
 0x13a   :  { %v479_v25 = vadd.f32 %v447_v48, %v282_v45 }
 0x13b   :  { %v335_v61 = vpop.permute.xlu1 %334 }
 0x13c   :  { %v432_v28 = vmul.f32 %v1612_v1, %v335_v61 }
 0x13e   :  { %v464_v23 = vadd.f32 %v432_v28, %v267_v5 }
 0x140   :  { %v661_v63 = vadd.f32 %v629_v58, %v464_v23  ;;  %v203_v6 = vpop.permute.xlu1 %202  ;;  %v648_v23 = vmul.f32 %v1630_v8, %v608_v20 }
 0x141   :  { %v252_v43 = vmul.f32 %v1605_v62, %v203_v6  ;;  %v239_v6 = vmul.f32 %v1605_v62, %v1582_v52 }
 0x142   :  { %v693_v42 = vmax.f32 %v661_v63, 0.0 }
 0x143   :  { %v284_v50 = vadd.f32 %v1620_v4, %v252_v43 }
 0x144   :  { %1212 = vmatmul.mubr.msk.f32.gmra.mrb[10].mxu0 %vm725_vm0, %v693_v42 }
 0x145   :  { %v592_v7 = vpop.permute.xlu1 %591  ;;  %1214 = vmatprep.mubr.msk.f32.mxu0 %vm725_vm0, %v694_v37 }
 0x146   :  { %v644_v9 = vmul.f32 %v1630_v8, %v592_v7  ;;  %v271_v7 = vadd.f32 %v1620_v4, %v239_v6 }
 0x148   :  { %v676_v2 = vadd.f32 %v644_v9, %v479_v25 }
 0x14a   :  { %v708_v55 = vmax.f32 %v676_v2, 0.0  ;;  %v208_v53 = vpop.permute.xlu1 %207 }
 0x14b   :  { %v253_v30 = vmul.f32 %v1605_v62, %v208_v53  ;;  %v452_v53 = vmul.f32 %v1612_v1, %v1714_v38 }
 0x14c   :  { %1235 = vmatprep.mubr.msk.f32.mxu1 %vm725_vm0, %v708_v55 }
 0x14d   :  { %v285_v41 = vadd.f32 %v1620_v4, %v253_v30 }
 0x14f   :  { %v596_v13 = vpop.permute.xlu1 %595  ;;  %v482_v35 = vadd.f32 %v450_v54, %v285_v41 }
 0x150   :  { %v645_v22 = vmul.f32 %v1630_v8, %v596_v13 }
 0x152   :  { %v677_v34 = vadd.f32 %v645_v22, %v480_v10 }
 0x154   :  { %v709_v17 = vmax.f32 %v677_v34, 0.0  ;;  %v403_v16 = vpop.permute.xlu1 %402 }
 0x155   :  { %v449_v15 = vmul.f32 %v1612_v1, %v403_v16 }
 0x156   :  { %1236 = vmatmul.mubr.msk.f32.gmra.mrb[10].mxu1 %vm725_vm0, %v709_v17 }
 0x157   :  { %v481_v51 = vadd.f32 %v449_v15, %v284_v50 }
 0x158   :  { %v343_v18 = vpop.permute.xlu1 %342 }
 0x159   :  { %v434_v46 = vmul.f32 %v1612_v1, %v343_v18 }
 0x15b   :  { %v466_v26 = vadd.f32 %v434_v46, %v269_v40 }
 0x15d   :  { %v663_v44 = vadd.f32 %v631_v21, %v466_v26  ;;  %v213_v33 = vpop.permute.xlu1 %212 }
 0x15e   :  { %v254_v39 = vmul.f32 %v1605_v62, %v213_v33 }
 0x15f   :  { %v695_v12 = vmax.f32 %v663_v44, 0.0 }
 0x160   :  { %v286_v58 = vadd.f32 %v1620_v4, %v254_v39 }
 0x161   :  { %1215 = vmatmul.mubr.msk.f32.gmra.mrb[12].mxu0 %vm725_vm0, %v695_v12 }
 0x162   :  { %v600_v47 = vpop.permute.xlu1 %599 }
 0x163   :  { %v646_v59 = vmul.f32 %v1630_v8, %v600_v47 }
 0x165   :  { %v678_v29 = vadd.f32 %v646_v59, %v481_v51 }
 0x167   :  { %v710_v31 = vmax.f32 %v678_v29, 0.0  ;;  %v218_v19 = vpop.permute.xlu1 %217 }
 0x168   :  { %v255_v42 = vmul.f32 %v1605_v62, %v218_v19 }
 0x169   :  { %1238 = vmatprep.mubr.msk.f32.mxu1 %vm725_vm0, %v710_v31 }
 0x16a   :  { %v287_v36 = vadd.f32 %v1620_v4, %v255_v42  ;;  %v1893_v4 = vld [vmem:[%s2059_s4] ss:$0 sm:$0xff] }
 0x16c   :  { %v604_v11 = vpop.permute.xlu1 %603  ;;  %v484_v13 = vadd.f32 %v452_v53, %v287_v36 }
 0x16d   :  { %v647_v0 = vmul.f32 %v1630_v8, %v604_v11 }
 0x16f   :  { %v679_v14 = vadd.f32 %v647_v0, %v482_v35 }
 0x171   :  { %v711_v61 = vmax.f32 %v679_v14, 0.0  ;;  %v411_v5 = vpop.permute.xlu1 %410 }
 0x172   :  { %v451_v28 = vmul.f32 %v1612_v1, %v411_v5 }
 0x173   :  { %1239 = vmatmul.mubr.msk.f32.gmra.mrb[12].mxu1 %vm725_vm0, %v711_v61 }
 0x174   :  { %v483_v60 = vadd.f32 %v451_v28, %v286_v58 }
 0x175   :  { %v351_v56 = vpop.permute.xlu1 %350 }
 0x176   :  { %v680_v57 = vadd.f32 %v648_v23, %v483_v60  ;;  %v436_v37 = vmul.f32 %v1612_v1, %v351_v56 }
 0x178   :  { %v712_v63 = vmax.f32 %v680_v57, 0.0  ;;  %v468_v2 = vadd.f32 %v436_v37, %v271_v7 }
 0x17a   :  { %v544_v48 = vpop.permute.xlu1 %543  ;;  %1241 = vmatprep.mubr.msk.f32.mxu1 %vm725_vm0, %v712_v63 }
 0x17b   :  { %v632_v45 = vmul.f32 %v1630_v8, %v544_v48 }
 0x17d   :  { %v664_v25 = vadd.f32 %v632_v45, %v1707_v3 }
 0x17e   :  { %v548_v9 = vpop.permute.xlu1 %547 }
 0x17f   :  { %v696_v55 = vmax.f32 %v664_v25, 0.0  ;;  %v633_v52 = vmul.f32 %v1630_v8, %v548_v9 }
 0x181   :  { %v665_v49 = vadd.f32 %v633_v52, %v468_v2  ;;  %1217 = vmatprep.mubr.msk.f32.mxu0 %vm725_vm0, %v696_v55 }
 0x182   :  { %v612_v62 = vpop.permute.xlu1 %611 }
 0x183   :  { %v697_v32 = vmax.f32 %v665_v49, 0.0  ;;  %v649_v10 = vmul.f32 %v1630_v8, %v612_v62 }
 0x185   :  { %v681_v22 = vadd.f32 %v649_v10, %v484_v13  ;;  %1218 = vmatmul.mubr.msk.f32.gmra.mrb[14].mxu0 %vm725_vm0, %v697_v32 }
 0x187   :  { %v713_v3 = vmax.f32 %v681_v22, 0.0 }
 0x189   :  { %1242 = vmatmul.mubr.msk.f32.gmra.mrb[14].mxu1 %vm725_vm0, %v713_v3 }
 0x198   :  { %v1222_v1 = vpop.f32.mrb[0].mxu1 }
 0x199   :  { %v974_v38 = vadd.f32 %v1222_v1, %v1893_v4  ;;  %v968_v34 = vpop.f32.mrb[1].mxu1 }
 0x19a   :  { %v969_v17 = vadd.f32 %v1893_v4, %v968_v34 }
 0x19b   :  { %v1064_v16 = vmax.f32 %v974_v38, 0.0 }
 0x19c   :  { %v1063_v27 = vmax.f32 %v969_v17, 0.0 }
 0x19d   :  { %1096 = vst.msk [vmem:[%s2060_s5 + $0x88] sm:$0xff] %vm725_vm0, %v1064_v16 }
 0x19e   :  { %1095 = vst.msk [vmem:[%s2060_s5 + $0x80] sm:$0xff] %vm725_vm0, %v1063_v27 }
 0x1b5   :  { %v1225_v8 = vpop.f32.mrb[2].mxu1 }
 0x1b6   :  { %v984_v18 = vadd.f32 %v1225_v8, %v1893_v4  ;;  %v978_v40 = vpop.f32.mrb[3].mxu1 }
 0x1b7   :  { %v979_v46 = vadd.f32 %v1893_v4, %v978_v40 }
 0x1b8   :  { %v1066_v24 = vmax.f32 %v984_v18, 0.0 }
 0x1b9   :  { %v1065_v21 = vmax.f32 %v979_v46, 0.0 }
 0x1ba   :  { %1098 = vst.msk [vmem:[%s2060_s5 + $0x98] sm:$0xff] %vm725_vm0, %v1066_v24 }
 0x1bb   :  { %1097 = vst.msk [vmem:[%s2060_s5 + $0x90] sm:$0xff] %vm725_vm0, %v1065_v21 }
 0x1c5   :  { %v1198_v26 = vpop.f32.mrb[0].mxu0 }
 0x1c6   :  { %v894_v43 = vadd.f32 %v1198_v26, %v1893_v4  ;;  %v888_v44 = vpop.f32.mrb[1].mxu0 }
 0x1c7   :  { %v889_v33 = vadd.f32 %v1893_v4, %v888_v44 }
 0x1c8   :  { %v1048_v15 = vmax.f32 %v894_v43, 0.0 }
 0x1c9   :  { %v1047_v12 = vmax.f32 %v889_v33, 0.0 }
 0x1ca   :  { %1080 = vst.msk [vmem:[%s2060_s5 + $0x8] sm:$0xff] %vm725_vm0, %v1048_v15 }
 0x1cb   :  { %1079 = vst.msk [vmem:[%s2060_s5] sm:$0xff] %vm725_vm0, %v1047_v12 }
 0x1cd   :  { %v1201_v50 = vpop.f32.mrb[2].mxu0 }
 0x1ce   :  { %v904_v47 = vadd.f32 %v1201_v50, %v1893_v4  ;;  %v898_v51 = vpop.f32.mrb[3].mxu0 }
 0x1cf   :  { %v899_v59 = vadd.f32 %v1893_v4, %v898_v51 }
 0x1d0   :  { %v1050_v30 = vmax.f32 %v904_v47, 0.0 }
 0x1d1   :  { %v1049_v29 = vmax.f32 %v899_v59, 0.0 }
 0x1d2   :  { %1082 = vst.msk [vmem:[%s2060_s5 + $0x18] sm:$0xff] %vm725_vm0, %v1050_v30  ;;  %v1228_v31 = vpop.f32.mrb[4].mxu1 }
 0x1d3   :  { %1081 = vst.msk [vmem:[%s2060_s5 + $0x10] sm:$0xff] %vm725_vm0, %v1049_v29  ;;  %v994_v19 = vadd.f32 %v1228_v31, %v1893_v4  ;;  %v988_v41 = vpop.f32.mrb[5].mxu1 }
 0x1d4   :  { %v989_v54 = vadd.f32 %v1893_v4, %v988_v41 }
 0x1d5   :  { %v1068_v11 = vmax.f32 %v994_v19, 0.0  ;;  %v1204_v35 = vpop.f32.mrb[4].mxu0 }
 0x1d6   :  { %v1067_v0 = vmax.f32 %v989_v54, 0.0  ;;  %v914_v39 = vadd.f32 %v1204_v35, %v1893_v4  ;;  %v908_v14 = vpop.f32.mrb[5].mxu0 }
 0x1d7   :  { %1100 = vst.msk [vmem:[%s2060_s5 + $0xa8] sm:$0xff] %vm725_vm0, %v1068_v11  ;;  %v909_v20 = vadd.f32 %v1893_v4, %v908_v14 }
 0x1d8   :  { %1099 = vst.msk [vmem:[%s2060_s5 + $0xa0] sm:$0xff] %vm725_vm0, %v1067_v0  ;;  %v1052_v61 = vmax.f32 %v914_v39, 0.0 }
 0x1d9   :  { %v1051_v5 = vmax.f32 %v909_v20, 0.0 }
 0x1da   :  { %1084 = vst.msk [vmem:[%s2060_s5 + $0x28] sm:$0xff] %vm725_vm0, %v1052_v61 }
 0x1db   :  { %1083 = vst.msk [vmem:[%s2060_s5 + $0x20] sm:$0xff] %vm725_vm0, %v1051_v5 }
 0x1dd   :  { %v1207_v58 = vpop.f32.mrb[6].mxu0 }
 0x1de   :  { %v924_v28 = vadd.f32 %v1207_v58, %v1893_v4  ;;  %v918_v23 = vpop.f32.mrb[7].mxu0 }
 0x1df   :  { %v919_v60 = vadd.f32 %v1893_v4, %v918_v23 }
 0x1e0   :  { %v1054_v56 = vmax.f32 %v924_v28, 0.0 }
 0x1e1   :  { %v1053_v57 = vmax.f32 %v919_v60, 0.0 }
 0x1e2   :  { %1086 = vst.msk [vmem:[%s2060_s5 + $0x38] sm:$0xff] %vm725_vm0, %v1054_v56 }
 0x1e3   :  { %1085 = vst.msk [vmem:[%s2060_s5 + $0x30] sm:$0xff] %vm725_vm0, %v1053_v57 }
 0x1ef   :  { %v1231_v63 = vpop.f32.mrb[6].mxu1 }
 0x1f0   :  { %v1004_v6 = vadd.f32 %v1231_v63, %v1893_v4  ;;  %v998_v48 = vpop.f32.mrb[7].mxu1 }
 0x1f1   :  { %v999_v42 = vadd.f32 %v1893_v4, %v998_v48 }
 0x1f2   :  { %v1070_v37 = vmax.f32 %v1004_v6, 0.0 }
 0x1f3   :  { %v1069_v45 = vmax.f32 %v999_v42, 0.0 }
 0x1f4   :  { %1102 = vst.msk [vmem:[%s2060_s5 + $0xb8] sm:$0xff] %vm725_vm0, %v1070_v37 }
 0x1f5   :  { %1101 = vst.msk [vmem:[%s2060_s5 + $0xb0] sm:$0xff] %vm725_vm0, %v1069_v45 }
 0x1fa   :  { %v1210_v7 = vpop.f32.mrb[8].mxu0 }
 0x1fb   :  { %v934_v25 = vadd.f32 %v1210_v7, %v1893_v4  ;;  %v928_v9 = vpop.f32.mrb[9].mxu0 }
 0x1fc   :  { %v929_v36 = vadd.f32 %v1893_v4, %v928_v9 }
 0x1fd   :  { %v1056_v2 = vmax.f32 %v934_v25, 0.0 }
 0x1fe   :  { %v1055_v55 = vmax.f32 %v929_v36, 0.0 }
 0x1ff   :  { %1088 = vst.msk [vmem:[%s2060_s5 + $0x48] sm:$0xff] %vm725_vm0, %v1056_v2 }
 0x200   :  { %1087 = vst.msk [vmem:[%s2060_s5 + $0x40] sm:$0xff] %vm725_vm0, %v1055_v55 }
 0x20c   :  { %v1234_v52 = vpop.f32.mrb[8].mxu1 }
 0x20d   :  { %v1014_v53 = vadd.f32 %v1234_v52, %v1893_v4  ;;  %v1008_v49 = vpop.f32.mrb[9].mxu1 }
 0x20e   :  { %v1009_v62 = vadd.f32 %v1893_v4, %v1008_v49 }
 0x20f   :  { %v1072_v32 = vmax.f32 %v1014_v53, 0.0 }
 0x210   :  { %v1071_v13 = vmax.f32 %v1009_v62, 0.0 }
 0x211   :  { %1104 = vst.msk [vmem:[%s2060_s5 + $0xc8] sm:$0xff] %vm725_vm0, %v1072_v32 }
 0x212   :  { %1103 = vst.msk [vmem:[%s2060_s5 + $0xc0] sm:$0xff] %vm725_vm0, %v1071_v13 }
 0x217   :  { %v1213_v10 = vpop.f32.mrb[10].mxu0 }
 0x218   :  { %v944_v22 = vadd.f32 %v1213_v10, %v1893_v4  ;;  %v938_v3 = vpop.f32.mrb[11].mxu0 }
 0x219   :  { %v939_v1 = vadd.f32 %v1893_v4, %v938_v3 }
 0x21a   :  { %v1058_v38 = vmax.f32 %v944_v22, 0.0 }
 0x21b   :  { %v1057_v34 = vmax.f32 %v939_v1, 0.0 }
 0x21c   :  { %1090 = vst.msk [vmem:[%s2060_s5 + $0x58] sm:$0xff] %vm725_vm0, %v1058_v38 }
 0x21d   :  { %1089 = vst.msk [vmem:[%s2060_s5 + $0x50] sm:$0xff] %vm725_vm0, %v1057_v34 }
 0x229   :  { %v1237_v17 = vpop.f32.mrb[10].mxu1 }
 0x22a   :  { %v1024_v16 = vadd.f32 %v1237_v17, %v1893_v4  ;;  %v1018_v27 = vpop.f32.mrb[11].mxu1 }
 0x22b   :  { %v1019_v8 = vadd.f32 %v1893_v4, %v1018_v27 }
 0x22c   :  { %v1074_v18 = vmax.f32 %v1024_v16, 0.0 }
 0x22d   :  { %v1073_v40 = vmax.f32 %v1019_v8, 0.0 }
 0x22e   :  { %1106 = vst.msk [vmem:[%s2060_s5 + $0xd8] sm:$0xff] %vm725_vm0, %v1074_v18 }
 0x22f   :  { %1105 = vst.msk [vmem:[%s2060_s5 + $0xd0] sm:$0xff] %vm725_vm0, %v1073_v40 }
 0x234   :  { %v1216_v46 = vpop.f32.mrb[12].mxu0 }
 0x235   :  { %v954_v24 = vadd.f32 %v1216_v46, %v1893_v4  ;;  %v948_v21 = vpop.f32.mrb[13].mxu0 }
 0x236   :  { %v949_v26 = vadd.f32 %v1893_v4, %v948_v21 }
 0x237   :  { %v1060_v43 = vmax.f32 %v954_v24, 0.0 }
 0x238   :  { %v1059_v44 = vmax.f32 %v949_v26, 0.0 }
 0x239   :  { %1092 = vst.msk [vmem:[%s2060_s5 + $0x68] sm:$0xff] %vm725_vm0, %v1060_v43 }
 0x23a   :  { %1091 = vst.msk [vmem:[%s2060_s5 + $0x60] sm:$0xff] %vm725_vm0, %v1059_v44 }
 0x246   :  { %v1240_v33 = vpop.f32.mrb[12].mxu1 }
 0x247   :  { %v1034_v15 = vadd.f32 %v1240_v33, %v1893_v4  ;;  %v1028_v12 = vpop.f32.mrb[13].mxu1 }
 0x248   :  { %v1029_v50 = vadd.f32 %v1893_v4, %v1028_v12 }
 0x249   :  { %v1076_v47 = vmax.f32 %v1034_v15, 0.0 }
 0x24a   :  { %v1075_v51 = vmax.f32 %v1029_v50, 0.0 }
 0x24b   :  { %1108 = vst.msk [vmem:[%s2060_s5 + $0xe8] sm:$0xff] %vm725_vm0, %v1076_v47 }
 0x24c   :  { %1107 = vst.msk [vmem:[%s2060_s5 + $0xe0] sm:$0xff] %vm725_vm0, %v1075_v51 }
 0x258   :  { %v1219_v59 = vpop.f32.mrb[14].mxu0 }
 0x259   :  { %v964_v30 = vadd.f32 %v1219_v59, %v1893_v4  ;;  %v958_v29 = vpop.f32.mrb[15].mxu0 }
 0x25a   :  { %v959_v31 = vadd.f32 %v1893_v4, %v958_v29 }
 0x25b   :  { %v1062_v19 = vmax.f32 %v964_v30, 0.0 }
 0x25c   :  { %v1061_v41 = vmax.f32 %v959_v31, 0.0  ;;  %v1243_v54 = vpop.f32.mrb[14].mxu1 }
 0x25d   :  { %1094 = vst.msk [vmem:[%s2060_s5 + $0x78] sm:$0xff] %vm725_vm0, %v1062_v19  ;;  %v1044_v11 = vadd.f32 %v1243_v54, %v1893_v4  ;;  %v1038_v35 = vpop.f32.mrb[15].mxu1 }
 0x25e   :  { %1093 = vst.msk [vmem:[%s2060_s5 + $0x70] sm:$0xff] %vm725_vm0, %v1061_v41  ;;  %v1039_v0 = vadd.f32 %v1893_v4, %v1038_v35 }
 0x25f   :  { %v1078_v39 = vmax.f32 %v1044_v11, 0.0 }
 0x260   :  { %v1077_v14 = vmax.f32 %v1039_v0, 0.0 }
 0x261   :  { %1110 = vst.msk [vmem:[%s2060_s5 + $0xf8] sm:$0xff] %vm725_vm0, %v1078_v39 }
 0x262   :  { %1109 = vst.msk [vmem:[%s2060_s5 + $0xf0] sm:$0xff] %vm725_vm0, %v1077_v14 }

</bundles_post_ra>
